<compile_context>
chip_gen: v7x
topology: tpu7x:2x2x1
jax: 0.10.0
libtpu: 0.0.40
codegen_flags: <defaults>
</compile_context>

<pallas_src>
import functools

import jax
import jax.numpy as jnp
import numpy as np
from jax.experimental import pallas as pl
from jax.experimental.pallas import tpu as pltpu

# ---- hyperparameters (CombinedLoss.__init__ defaults) ----
POS_WEIGHT = 1.0
ALPHA_DICE = 0.5
ALPHA_FOCAL = 0.5
FOCAL_ALPHA = 0.25
FOCAL_GAMMA = 2.0   # kernel assumes gamma == 2 (explicit square)
DICE_SMOOTH = 1e-6

# Fast path assumes binary {0,1} targets and pos_weight == 1 (true for the
# segmentation masks this module is trained with).  Set False to use the
# module's literal exp(-bce) / two-log formulation (soft labels, pos_weight!=1).
ASSUME_BINARY_TARGETS = True

LANE = 128
SUBLANE = 8
ROW_TILE_TARGET = 2048   # rows per grid step: 2 inputs x 2 bufs x 1 MiB = 4 MiB


def _combined_loss_kernel(preds_ref, targets_ref, out_ref, *,
                          row_tile, num_blocks, tail_valid):
    j = pl.program_id(0)

    @pl.when(j == 0)
    def _init():
        out_ref[...] = jnp.zeros_like(out_ref)

    def fold(q):
        # (row_tile, 128) -> (8, 128) using only sublane-aligned VPU adds.
        return jnp.sum(q.reshape(row_tile // SUBLANE, SUBLANE, LANE), axis=0)

    def accumulate(x, t, mf=None):
        p = jax.nn.sigmoid(x)

        inter = p * t                      # dice numerator partial
        denom = p + t                      # dice denominator partial

        if ASSUME_BINARY_TARGETS and POS_WEIGHT == 1.0:
            # One log + one sigmoid per element:
            #   log(1-p) == log(p) - x            (p = sigmoid(x))
            #   exp(-bce) == t*(p+eps)+(1-t)*(1-p+eps)   for t in {0,1}
            log_p = jnp.log(p + 1e-8)
            bce = (1.0 - t) * x - log_p
            pt = t * (p + 1e-8) + (1.0 - t) * (1.0 - p + 1e-8)
        else:
            # Literal module formulation (soft labels / pos_weight != 1).
            log_p = jnp.log(p + 1e-8)
            log_1mp = jnp.log(1.0 - p + 1e-8)
            bce = -(POS_WEIGHT * t * log_p) - (1.0 - t) * log_1mp
            pt = jnp.exp(-bce)

        one_m_pt = 1.0 - pt
        focal = FOCAL_ALPHA * (one_m_pt * one_m_pt) * bce     # gamma == 2

        if mf is not None:
            denom = denom * mf
            focal = focal * mf
            # inter is already zero on masked elements (t was zeroed there).

        out_ref[0, :, :] += fold(inter)
        out_ref[1, :, :] += fold(denom)
        out_ref[2, :, :] += fold(focal)

    full_block = row_tile * LANE
    if tail_valid == full_block:
        # Every block fully valid: unmasked path everywhere.
        accumulate(preds_ref[...].astype(jnp.float32),
                   targets_ref[...].astype(jnp.float32))
    else:
        # Interior blocks: unmasked fast path (no iota / where / mask mults).
        if num_blocks > 1:
            @pl.when(j < num_blocks - 1)
            def _interior():
                accumulate(preds_ref[...].astype(jnp.float32),
                           targets_ref[...].astype(jnp.float32))

        # Tail block only: mask padded / out-of-bounds elements.  Indices are
        # block-local, so int32 can never overflow regardless of tensor size.
        @pl.when(j == num_blocks - 1)
        def _tail():
            row_ids = jax.lax.broadcasted_iota(jnp.int32, (row_tile, LANE), 0)
            col_ids = jax.lax.broadcasted_iota(jnp.int32, (row_tile, LANE), 1)
            valid = row_ids * LANE + col_ids < tail_valid
            mf = valid.astype(jnp.float32)
            # Sanitize: the out-of-bounds tail of an edge block is unspecified.
            x = jnp.where(valid, preds_ref[...].astype(jnp.float32), 0.0)
            t = jnp.where(valid, targets_ref[...].astype(jnp.float32), 0.0)
            accumulate(x, t, mf)


def combined_loss(preds, targets):
    """preds (logits) and targets of identical shape, e.g. NCHW (B, C, H, W)."""
    preds = jnp.asarray(preds)
    targets = jnp.asarray(targets)
    n = int(preds.size)

    flat_p = preds.reshape(-1)
    flat_t = targets.reshape(-1)

    # Pad (only when needed) so the flat arrays reshape to (rows, 128) with
    # rows % 8 == 0.  We do NOT pad further to a multiple of row_tile: the edge
    # block is handled by Pallas' partial-block DMA plus the in-kernel tail
    # mask, avoiding an extra full HBM pass through jnp.pad.
    pad_unit = SUBLANE * LANE
    n_padded = ((n + pad_unit - 1) // pad_unit) * pad_unit
    if n_padded != n:
        flat_p = jnp.pad(flat_p, (0, n_padded - n))
        flat_t = jnp.pad(flat_t, (0, n_padded - n))

    rows = n_padded // LANE
    row_tile = min(ROW_TILE_TARGET, rows)          # both multiples of 8
    preds2d = flat_p.reshape(rows, LANE)
    targets2d = flat_t.reshape(rows, LANE)

    num_blocks = -(-rows // row_tile)
    tail_valid = n - (num_blocks - 1) * row_tile * LANE   # valid elems, last blk

    kernel = functools.partial(
        _combined_loss_kernel,
        row_tile=row_tile, num_blocks=num_blocks, tail_valid=tail_valid)

    tile_spec = pl.BlockSpec((row_tile, LANE), lambda j: (j, 0))

    # TODO(synk): on 2-TC chips (v7x) a leading CORE_PARALLEL grid axis (or
    # pl.core_map) would engage both TensorCores; kept single-core here so
    # single-TC v5e/v6e don't pay a duplicated-block DMA / extra grid step.
    partials = pl.pallas_call(
        kernel,
        out_shape=jax.ShapeDtypeStruct((3, SUBLANE, LANE), jnp.float32),
        grid_spec=pltpu.PrefetchScalarGridSpec(
            num_scalar_prefetch=0,
            grid=(num_blocks,),
            in_specs=[tile_spec, tile_spec],
            out_specs=pl.BlockSpec((3, SUBLANE, LANE), lambda j: (0, 0, 0)),
        ),
        compiler_params=pltpu.CompilerParams(
            dimension_semantics=("arbitrary",),
            vmem_limit_bytes=32 * 1024 * 1024),
    )(preds2d, targets2d)

    # Tiny epilogue in plain JAX: cross-lane reduce + scalar loss combine.
    sums = jnp.sum(partials, axis=(1, 2))          # (3,)
    inter, denom, focal_sum = sums[0], sums[1], sums[2]

    dice = (2.0 * inter + DICE_SMOOTH) / (denom + DICE_SMOOTH)
    loss_dice = 1.0 - dice
    loss_focal = focal_sum / n
    return ALPHA_DICE * loss_dice + ALPHA_FOCAL * loss_focal


def _reference_loss(preds, targets):
    p = jax.nn.sigmoid(preds.reshape(-1).astype(jnp.float32))
    t = targets.reshape(-1).astype(jnp.float32)
    inter = jnp.sum(p * t)
    dice = (2.0 * inter + DICE_SMOOTH) / (jnp.sum(p) + jnp.sum(t) + DICE_SMOOTH)
    loss_dice = 1.0 - dice
    bce = -POS_WEIGHT * t * jnp.log(p + 1e-8) - (1.0 - t) * jnp.log(1.0 - p + 1e-8)
    pt = jnp.exp(-bce)
    focal = FOCAL_ALPHA * jnp.power(1.0 - pt, FOCAL_GAMMA) * bce
    loss_focal = jnp.mean(focal)
    return ALPHA_DICE * loss_dice + ALPHA_FOCAL * loss_focal


if __name__ == "__main__":
    key = jax.random.PRNGKey(0)
    k1, k2, k3, k4, k5, k6 = jax.random.split(key, 6)

    # 1) NCHW logits + binary masks, numel % 1024 == 0 (pure fast path).
    preds = jax.random.normal(k1, (2, 4, 16, 16), dtype=jnp.float32)
    targets = (jax.random.uniform(k2, (2, 4, 16, 16)) > 0.5).astype(jnp.float32)
    loss = combined_loss(preds, targets)
    jax.block_until_ready(loss)
    np.testing.assert_allclose(np.asarray(loss),
                               np.asarray(_reference_loss(preds, targets)),
                               rtol=1e-5, atol=1e-6)

    # 2) Ragged size: pad + in-kernel tail masking, single block.
    preds_r = jax.random.normal(k3, (1, 3, 7, 9), dtype=jnp.float32)
    targets_r = (jax.random.uniform(k4, (1, 3, 7, 9)) > 0.5).astype(jnp.float32)
    loss_r = combined_loss(preds_r, targets_r)
    jax.block_until_ready(loss_r)
    np.testing.assert_allclose(np.asarray(loss_r),
                               np.asarray(_reference_loss(preds_r, targets_r)),
                               rtol=1e-5, atol=1e-6)

    # 3) Multi-block + partial edge block (interior fast path + masked tail).
    #    Looser rtol: kernel and reference accumulate ~270k f32 terms in
    #    different orders.
    preds_m = jax.random.normal(k5, (2, 3, 211, 213), dtype=jnp.float32)
    targets_m = (jax.random.uniform(k6, (2, 3, 211, 213)) > 0.5).astype(jnp.float32)
    loss_m = combined_loss(preds_m, targets_m)
    jax.block_until_ready(loss_m)
    np.testing.assert_allclose(np.asarray(loss_m),
                               np.asarray(_reference_loss(preds_m, targets_m)),
                               rtol=2e-4, atol=1e-6)

    print("KERNEL_OK")
</pallas_src>

<mosaic_0001>
module attributes {stable_mosaic.version = 11 : i64} {
  func.func @_combined_loss_kernel(%arg0: i32, %arg1: memref<16x128xf32, #tpu.memory_space<vmem>>, %arg2: memref<16x128xf32, #tpu.memory_space<vmem>>, %arg3: memref<3x8x128xf32, #tpu.memory_space<vmem>>) attributes {dimension_semantics = [#tpu.dimension_semantics<arbitrary>], iteration_bounds = array<i64: 1>, scalar_prefetch = 0 : i64, scratch_operands = 0 : i64, tpu.core_type = #tpu.core_type<tc>, window_params = [{transform_indices = @transform_0, window_bounds = array<i64: 16, 128>}, {transform_indices = @transform_1, window_bounds = array<i64: 16, 128>}, {pipeline_mode = #tpu.pipeline_mode<synchronous>, transform_indices = @transform_2, window_bounds = array<i64: 3, 8, 128>}]} {
    %c0_i32 = arith.constant 0 : i32
    %0 = arith.cmpi eq, %arg0, %c0_i32 : i32
    %1 = arith.extui %0 : i1 to i32
    %c0_i32_0 = arith.constant 0 : i32
    %2 = arith.cmpi ne, %1, %c0_i32_0 : i32
    scf.if %2 {
      %cst_31 = arith.constant 0.000000e+00 : f32
      %60 = vector.broadcast %cst_31 : f32 to vector<3x8x128xf32>
      %c0_32 = arith.constant 0 : index
      %c0_33 = arith.constant 0 : index
      %c0_34 = arith.constant 0 : index
      %61 = vector.load %arg3[%c0_32, %c0_33, %c0_34] : memref<3x8x128xf32, #tpu.memory_space<vmem>>, vector<3x8x128xf32>
      tpu.vector_store %arg3[%c0_32, %c0_33, %c0_34], %60 {strides = array<i32>} : memref<3x8x128xf32, #tpu.memory_space<vmem>>, vector<3x8x128xf32>,
    } else {
    }
    %c0 = arith.constant 0 : index
    %c0_1 = arith.constant 0 : index
    %3 = vector.load %arg1[%c0, %c0_1] : memref<16x128xf32, #tpu.memory_space<vmem>>, vector<16x128xf32>
    %c0_2 = arith.constant 0 : index
    %c0_3 = arith.constant 0 : index
    %4 = vector.load %arg2[%c0_2, %c0_3] : memref<16x128xf32, #tpu.memory_space<vmem>>, vector<16x128xf32>
    %5 = arith.negf %3 : vector<16x128xf32>
    %6 = math.exp %5 : vector<16x128xf32>
    %cst = arith.constant 1.000000e+00 : f32
    %7 = vector.broadcast %cst : f32 to vector<16x128xf32>
    %8 = arith.addf %7, %6 : vector<16x128xf32>
    %9 = arith.divf %7, %8 : vector<16x128xf32>
    %10 = arith.mulf %9, %4 : vector<16x128xf32>
    %11 = arith.addf %9, %4 : vector<16x128xf32>
    %cst_4 = arith.constant 9.99999993E-9 : f32
    %12 = vector.broadcast %cst_4 : f32 to vector<16x128xf32>
    %13 = arith.addf %9, %12 : vector<16x128xf32>
    %14 = math.log %13 : vector<16x128xf32>
    %cst_5 = arith.constant 1.000000e+00 : f32
    %15 = vector.broadcast %cst_5 : f32 to vector<16x128xf32>
    %16 = arith.subf %15, %4 : vector<16x128xf32>
    %17 = arith.mulf %16, %3 : vector<16x128xf32>
    %18 = arith.subf %17, %14 : vector<16x128xf32>
    %cst_6 = arith.constant 9.99999993E-9 : f32
    %19 = vector.broadcast %cst_6 : f32 to vector<16x128xf32>
    %20 = arith.addf %9, %19 : vector<16x128xf32>
    %21 = arith.mulf %4, %20 : vector<16x128xf32>
    %cst_7 = arith.constant 1.000000e+00 : f32
    %22 = vector.broadcast %cst_7 : f32 to vector<16x128xf32>
    %23 = arith.subf %22, %4 : vector<16x128xf32>
    %cst_8 = arith.constant 1.000000e+00 : f32
    %24 = vector.broadcast %cst_8 : f32 to vector<16x128xf32>
    %25 = arith.subf %24, %9 : vector<16x128xf32>
    %cst_9 = arith.constant 9.99999993E-9 : f32
    %26 = vector.broadcast %cst_9 : f32 to vector<16x128xf32>
    %27 = arith.addf %25, %26 : vector<16x128xf32>
    %28 = arith.mulf %23, %27 : vector<16x128xf32>
    %29 = arith.addf %21, %28 : vector<16x128xf32>
    %cst_10 = arith.constant 1.000000e+00 : f32
    %30 = vector.broadcast %cst_10 : f32 to vector<16x128xf32>
    %31 = arith.subf %30, %29 : vector<16x128xf32>
    %32 = arith.mulf %31, %31 : vector<16x128xf32>
    %cst_11 = arith.constant 2.500000e-01 : f32
    %33 = vector.broadcast %cst_11 : f32 to vector<16x128xf32>
    %34 = arith.mulf %33, %32 : vector<16x128xf32>
    %35 = arith.mulf %34, %18 : vector<16x128xf32>
    %c0_12 = arith.constant 0 : index
    %c0_13 = arith.constant 0 : index
    %c0_14 = arith.constant 0 : index
    %36 = vector.load %arg3[%c0_12, %c0_13, %c0_14] : memref<3x8x128xf32, #tpu.memory_space<vmem>>, vector<1x8x128xf32>
    %37 = vector.shape_cast %36 : vector<1x8x128xf32> to vector<8x128xf32>
    %38 = vector.shape_cast %10 : vector<16x128xf32> to vector<2x8x128xf32>
    %cst_15 = arith.constant dense<0.000000e+00> : vector<8x128xf32>
    %39 = vector.multi_reduction <add>, %38, %cst_15 [0] : vector<2x8x128xf32> to vector<8x128xf32>
    %40 = arith.addf %37, %39 : vector<8x128xf32>
    %c0_16 = arith.constant 0 : index
    %c0_17 = arith.constant 0 : index
    %c0_18 = arith.constant 0 : index
    %41 = vector.load %arg3[%c0_16, %c0_17, %c0_18] : memref<3x8x128xf32, #tpu.memory_space<vmem>>, vector<1x8x128xf32>
    %42 = vector.shape_cast %41 : vector<1x8x128xf32> to vector<8x128xf32>
    %43 = vector.shape_cast %40 : vector<8x128xf32> to vector<1x8x128xf32>
    tpu.vector_store %arg3[%c0_16, %c0_17, %c0_18], %43 {strides = array<i32>} : memref<3x8x128xf32, #tpu.memory_space<vmem>>, vector<1x8x128xf32>,
    %c1 = arith.constant 1 : index
    %c0_19 = arith.constant 0 : index
    %c0_20 = arith.constant 0 : index
    %44 = vector.load %arg3[%c1, %c0_19, %c0_20] : memref<3x8x128xf32, #tpu.memory_space<vmem>>, vector<1x8x128xf32>
    %45 = vector.shape_cast %44 : vector<1x8x128xf32> to vector<8x128xf32>
    %46 = vector.shape_cast %11 : vector<16x128xf32> to vector<2x8x128xf32>
    %cst_21 = arith.constant dense<0.000000e+00> : vector<8x128xf32>
    %47 = vector.multi_reduction <add>, %46, %cst_21 [0] : vector<2x8x128xf32> to vector<8x128xf32>
    %48 = arith.addf %45, %47 : vector<8x128xf32>
    %c1_22 = arith.constant 1 : index
    %c0_23 = arith.constant 0 : index
    %c0_24 = arith.constant 0 : index
    %49 = vector.load %arg3[%c1_22, %c0_23, %c0_24] : memref<3x8x128xf32, #tpu.memory_space<vmem>>, vector<1x8x128xf32>
    %50 = vector.shape_cast %49 : vector<1x8x128xf32> to vector<8x128xf32>
    %51 = vector.shape_cast %48 : vector<8x128xf32> to vector<1x8x128xf32>
    tpu.vector_store %arg3[%c1_22, %c0_23, %c0_24], %51 {strides = array<i32>} : memref<3x8x128xf32, #tpu.memory_space<vmem>>, vector<1x8x128xf32>,
    %c2 = arith.constant 2 : index
    %c0_25 = arith.constant 0 : index
    %c0_26 = arith.constant 0 : index
    %52 = vector.load %arg3[%c2, %c0_25, %c0_26] : memref<3x8x128xf32, #tpu.memory_space<vmem>>, vector<1x8x128xf32>
    %53 = vector.shape_cast %52 : vector<1x8x128xf32> to vector<8x128xf32>
    %54 = vector.shape_cast %35 : vector<16x128xf32> to vector<2x8x128xf32>
    %cst_27 = arith.constant dense<0.000000e+00> : vector<8x128xf32>
    %55 = vector.multi_reduction <add>, %54, %cst_27 [0] : vector<2x8x128xf32> to vector<8x128xf32>
    %56 = arith.addf %53, %55 : vector<8x128xf32>
    %c2_28 = arith.constant 2 : index
    %c0_29 = arith.constant 0 : index
    %c0_30 = arith.constant 0 : index
    %57 = vector.load %arg3[%c2_28, %c0_29, %c0_30] : memref<3x8x128xf32, #tpu.memory_space<vmem>>, vector<1x8x128xf32>
    %58 = vector.shape_cast %57 : vector<1x8x128xf32> to vector<8x128xf32>
    %59 = vector.shape_cast %56 : vector<8x128xf32> to vector<1x8x128xf32>
    tpu.vector_store %arg3[%c2_28, %c0_29, %c0_30], %59 {strides = array<i32>} : memref<3x8x128xf32, #tpu.memory_space<vmem>>, vector<1x8x128xf32>,
    return
  }
  func.func @transform_0(%arg0: i32) -> (i32, i32) {
    %c0_i32 = arith.constant 0 : i32
    %c0_i32_0 = arith.constant 0 : i32
    return %arg0, %c0_i32 : i32, i32
  }
  func.func @transform_1(%arg0: i32) -> (i32, i32) {
    %c0_i32 = arith.constant 0 : i32
    %c0_i32_0 = arith.constant 0 : i32
    return %arg0, %c0_i32 : i32, i32
  }
  func.func @transform_2(%arg0: i32) -> (i32, i32, i32) {
    %c0_i32 = arith.constant 0 : i32
    %c0_i32_0 = arith.constant 0 : i32
    %c0_i32_1 = arith.constant 0 : i32
    %c0_i32_2 = arith.constant 0 : i32
    return %c0_i32, %c0_i32_0, %c0_i32_1 : i32, i32, i32
  }
}

</mosaic_0001>

<bundles_post_ra>
// kernel: tpu_custom_call.1
= control target key start
LH: loop header
LB: loop body
LE: loop exit
PB: predicated region body
PF: predicated region fallthrough
CT: control target
= control target key end

     0   :  { %7 = vsyncpa [#allocation3], 0  ;;  %s286_s0 = inlined_call_operand.hbm [shape: f32[16,128], index: 0, kind: input, shape index: {}]   ;;  %s287_s1 = inlined_call_operand.hbm [shape: f32[16,128], index: 1, kind: input, shape index: {}]   ;;  %s288_s2 = inlined_call_operand.hbm [shape: f32[3,8,128], index: 2, kind: output, shape index: {}]  }
   0x1   :  { %8 = vsyncpa [#allocation6], 0 }
   0x2   :  { %9 = vsyncpa [#allocation4], 0  ;;  %s221_s9 = smov [#allocation2]   ;;  %s149_s13 = scalar_lea.hbm %s286_s0, 256 }
   0x3   :  { %s15_s10 = sshll.u32 %s221_s9, 4  ;;  %p150_p0 = scmp.ne.s32.totalorder %s286_s0, %s149_s13  ;;  %s16_s10 = int_to_ptr.vmem [resolvable:$true] %s15_s10 }
   0x4   :  { %p153_p1 = scmp.lt.u32.totalorder %s149_s13, %s286_s0 }
   0x6   :  { %p155_p2 = pnand %p153_p1, %p150_p0 }
   0x8   :  { %158 = shalt.err (!%p155_p2)
}
   0x9   :  { %s159_s18 = scalar_lea.vmem %s16_s10, 256  ;;  %p164_p4 = scmp.lt.s32.totalorder %s16_s10, %s16_s10 }
   0xa   :  { %p160_p3 = scmp.ne.s32.totalorder %s16_s10, %s159_s18  ;;  %p165_p5 = scmp.lt.s32.totalorder %s159_s18, %s159_s18 }
   0xc   :  { %p166_p6 = por %p165_p5, %p164_p4 }
   0xe   :  { %p167_p7 = pnand %p166_p6, %p160_p3 }
  0x10   :  { %170 = shalt.err (!%p167_p7)
}
  0x11   :  { %s222_s19 = smov 128   ;;  %s223_s20 = smov 8  }
  0x12   :  { %21 = dma.hbm_to_vmem [thread:$0]  %s286_s0, 256, %s16_s10, [#allocation3], %s222_s19, %s222_s19, %s223_s20  }
  0x13   :  { %s224_s23 = smov [#allocation5]   ;;  %s171_s27 = scalar_lea.hbm %s287_s1, 256 }
  0x14   :  { %s27_s24 = sshll.u32 %s224_s23, 4  ;;  %p172_p8 = scmp.ne.s32.totalorder %s287_s1, %s171_s27  ;;  %s28_s24 = int_to_ptr.vmem [resolvable:$true] %s27_s24 }
  0x15   :  { %p175_p9 = scmp.lt.u32.totalorder %s171_s27, %s287_s1 }
  0x17   :  { %p177_p10 = pnand %p175_p9, %p172_p8 }
  0x19   :  { %180 = shalt.err (!%p177_p10)
}
  0x1a   :  { %s181_s4 = scalar_lea.vmem %s28_s24, 256  ;;  %p186_p12 = scmp.lt.s32.totalorder %s28_s24, %s28_s24 }
  0x1b   :  { %p182_p11 = scmp.ne.s32.totalorder %s28_s24, %s181_s4  ;;  %p187_p13 = scmp.lt.s32.totalorder %s181_s4, %s181_s4 }
  0x1d   :  { %p188_p0 = por %p187_p13, %p186_p12 }
  0x1f   :  { %p189_p1 = pnand %p188_p0, %p182_p11 }
  0x21   :  { %192 = shalt.err (!%p189_p1)
}
  0x22   :  { %33 = dma.hbm_to_vmem [thread:$0]  %s287_s1, 256, %s28_s24, [#allocation6], %s222_s19, %s222_s19, %s223_s20  }
  0x23   :  { %215 = dma.done.wait [#allocation3], 256  }
  0x24   :  { %216 = vsyncadd [#allocation3], 4294967040 }
  0x25   :  { %217 = dma.done.wait [#allocation6], 256  }
  0x26   :  { %218 = vsyncadd [#allocation6], 4294967040  ;;  %v47_v0 = vld [vmem:[#allocation2] sm:$0xff]  ;;  %v48_v1 = vld [vmem:[#allocation2 + $0x8] sm:$0xff]  ;;  %s225_s1 = smov [#allocation7]  }
  0x27   :  { %v129_v2 = vmul.f32 -1.442695, %v47_v0  ;;  %v130_v3 = vmul.f32 -1.442695, %v48_v1  ;;  %v49_v8 = vld [vmem:[#allocation5] sm:$0xff]  ;;  %v50_v10 = vld [vmem:[#allocation5 + $0x8] sm:$0xff] }
  0x28   :  { %v73_v11 = vsub.f32 1.0, %v49_v8  ;;  %v74_v21 = vsub.f32 1.0, %v50_v10  ;;  %s116_s6 = sshll.u32 %s225_s1, 4  ;;  %s117_s6 = int_to_ptr.vmem [resolvable:$true] %s116_s6 }
  0x29   :  { %137 = vpow2.f32 %v129_v2  ;;  %s193_s7 = scalar_lea.vmem %s117_s6, 384  ;;  %p198_p3 = scmp.lt.s32.totalorder %s117_s6, %s117_s6 }
  0x2a   :  { %139 = vpow2.f32 %v130_v3  ;;  %v75_v35 = vmul.f32 %v73_v11, %v47_v0  ;;  %v76_v37 = vmul.f32 %v74_v21, %v48_v1  ;;  %p194_p2 = scmp.ne.s32.totalorder %s117_s6, %s193_s7  ;;  %p199_p4 = scmp.lt.s32.totalorder %s193_s7, %s193_s7 }
  0x2c   :  { %p200_p5 = por %p199_p4, %p198_p3 }
  0x2e   :  { %p201_p6 = pnand %p200_p5, %p194_p2 }
  0x33   :  { %v138_v4 = vpop.eup %137 }
  0x34   :  { %v140_v5 = vpop.eup %139  ;;  %v57_v6 = vadd.f32 1.0, %v138_v4 }
  0x35   :  { %v58_v7 = vadd.f32 1.0, %v140_v5 }
  0x36   :  { %141 = vrcp.f32 %v57_v6 }
  0x37   :  { %143 = vrcp.f32 %v58_v7 }
  0x40   :  { %v142_v9 = vpop.eup %141 }
  0x41   :  { %v144_v12 = vpop.eup %143  ;;  %v63_v13 = vmul.f32 %v142_v9, %v49_v8  ;;  %v65_v14 = vadd.f32 %v142_v9, %v49_v8  ;;  %v67_v15 = vadd.f32 1e-08, %v142_v9  ;;  %v81_v16 = vsub.f32 1.0, %v142_v9 }
  0x42   :  { %v64_v17 = vmul.f32 %v144_v12, %v50_v10  ;;  %v66_v18 = vadd.f32 %v144_v12, %v50_v10  ;;  %v68_v19 = vadd.f32 1e-08, %v144_v12  ;;  %v82_v20 = vsub.f32 1.0, %v144_v12 }
  0x43   :  { %145 = vlog2.f32 %v67_v15  ;;  %v79_v22 = vmul.f32 %v67_v15, %v49_v8  ;;  %v83_v23 = vadd.f32 1e-08, %v81_v16 }
  0x44   :  { %v98_v24 = vadd.f32 %v64_v17, %v63_v13  ;;  %v103_v25 = vadd.f32 %v66_v18, %v65_v14  ;;  %147 = vlog2.f32 %v68_v19  ;;  %v80_v26 = vmul.f32 %v68_v19, %v50_v10 }
  0x45   :  { %v84_v27 = vadd.f32 1e-08, %v82_v20  ;;  %v85_v28 = vmul.f32 %v83_v23, %v73_v11 }
  0x46   :  { %100 = vst [vmem:[#allocation7] sm:$0xff] %v98_v24  ;;  %105 = vst [vmem:[#allocation7 + $0x8] sm:$0xff] %v103_v25 }
  0x47   :  { %v86_v29 = vmul.f32 %v84_v27, %v74_v21  ;;  %v87_v30 = vadd.f32 %v85_v28, %v79_v22 }
  0x49   :  { %v88_v31 = vadd.f32 %v86_v29, %v80_v26  ;;  %v89_v32 = vsub.f32 1.0, %v87_v30 }
  0x4b   :  { %v90_v33 = vsub.f32 1.0, %v88_v31  ;;  %v91_v34 = vmul.f32 %v89_v32, %v89_v32 }
  0x4d   :  { %v146_v36 = vpop.eup %145  ;;  %v92_v38 = vmul.f32 %v90_v33, %v90_v33  ;;  %v93_v41 = vmul.f32 0.25, %v91_v34 }
  0x4e   :  { %v148_v39 = vpop.eup %147  ;;  %v70_v40 = vmul.f32 0.6931472, %v146_v36 }
  0x4f   :  { %v72_v42 = vmul.f32 0.6931472, %v148_v39  ;;  %v94_v43 = vmul.f32 0.25, %v92_v38 }
  0x50   :  { %v77_v44 = vsub.f32 %v75_v35, %v70_v40 }
  0x51   :  { %v78_v45 = vsub.f32 %v76_v37, %v72_v42 }
  0x52   :  { %v95_v46 = vmul.f32 %v93_v41, %v77_v44 }
  0x53   :  { %v96_v47 = vmul.f32 %v94_v43, %v78_v45 }
  0x55   :  { %v108_v48 = vadd.f32 %v96_v47, %v95_v46 }
  0x57   :  { %110 = vst [vmem:[#allocation7 + $0x10] sm:$0xff] %v108_v48 }
  0x58   :  { %204 = shalt.err (!%p201_p6)
}
  0x59   :  { %s205_s10 = scalar_lea.hbm %s288_s2, 384 }
  0x5a   :  { %p206_p7 = scmp.ne.s32.totalorder %s288_s2, %s205_s10  ;;  %p209_p8 = scmp.lt.u32.totalorder %s205_s10, %s288_s2 }
  0x5c   :  { %p211_p9 = pnand %p209_p8, %p206_p7 }
  0x5e   :  { %214 = shalt.err (!%p211_p9)
}
  0x5f   :  { %122 = dma.vmem_to_hbm [thread:$0]  %s117_s6, 384, %s288_s2, [#allocation4], %s222_s19, %s222_s19, %s223_s20  }
  0x60   :  { %219 = dma.done.wait [#allocation4], 384  }
  0x61   :  { %220 = vsyncadd [#allocation4], 4294966912 }
  0x62   :  { %126 = vsyncpa [#allocation3], 1 }
  0x63   :  { %127 = vsyncpa [#allocation6], 1 }
  0x64   :  { %128 = vsyncpa [#allocation4], 1 }

</bundles_post_ra>
